<compile_context>
chip_gen: v5e
topology: v5e:2x2
jax: 0.10.0
libtpu: 0.0.40
codegen_flags: <defaults>
</compile_context>

<pallas_src>
import numpy as np
import jax
import jax.numpy as jnp
from jax.experimental import pallas as pl
from jax.experimental.pallas import tpu as pltpu


_VMEM_BLOCK_BUDGET = 16 * 1024 * 1024   # budget for all resident block buffers
_VMEM_LIMIT_BYTES = 32 * 1024 * 1024    # scoped-VMEM limit, safe on v5e / v6e / v7x
_MAX_D_TILE = 2048                      # lane tile cap when the feature dim is huge
_MIN_GRID_STEPS = 4                     # keep the pipeline (and v7x's 2 TCs) busy


def _proto_kernel(z_ref, lab_ref, out_ref):
    # z_ref:   (Bt, N, Td)  features, native dtype (f32 / bf16)
    # lab_ref: (Bt, 1, N)   int32 dense labels
    # out_ref: (Bt, C, Td)  prototypes
    Bt, N, _ = z_ref.shape
    C = out_ref.shape[1]

    labels = lab_ref[...]                                            # [Bt, 1, N]
    class_ids = jax.lax.broadcasted_iota(jnp.int32, (Bt, C, N), 1)   # [Bt, C, N]
    eq = labels == class_ids                                         # broadcasts over C

    # 0/1 mask for the MXU in z's dtype (exact in any float dtype); counts in f32
    # so the epilogue is full precision even for bf16 inputs.
    mask = eq.astype(z_ref.dtype)                                    # [Bt, C, N]
    counts = jnp.sum(eq.astype(jnp.float32), axis=2, keepdims=True)  # [Bt, C, 1]

    # Batched matmul on the MXU with f32 accumulation.
    proto = jnp.einsum("bcn,bnd->bcd", mask, z_ref[...],
                       preferred_element_type=jnp.float32)           # [Bt, C, Td] f32

    # Exact division: counts is only O(Bt*C) elements, so the approximate
    # reciprocal saved nothing while costing accuracy (perf-review item).
    # Precondition (same as PyTorch): every class appears at least once per
    # batch element, otherwise counts == 0 -> inf/NaN.
    out_ref[...] = (proto / counts).astype(out_ref.dtype)


def infer_num_classes(support_labels):
    """One-time host-side validation (mirrors the PyTorch module). Do NOT call under jit."""
    lab = np.asarray(support_labels)
    if lab.min() != 0:
        raise ValueError("Expect labels to be 0-indexed.")
    per_batch_num_classes = np.unique(lab.max(axis=1)) + 1
    if per_batch_num_classes.size != 1:
        raise ValueError("Expect same number of classes for every point in the batch.")
    return int(per_batch_num_classes[0])


def protonet_create(z, support_labels, num_classes):
    """Compute class prototypes.

    Args:
      z: jnp.ndarray [B, N, D] extracted features (f32 or bf16; streamed as-is --
         bf16 roughly halves wall time since the kernel is HBM-bound).
      support_labels: jnp.ndarray [B, N] integer dense 0-indexed labels.
      num_classes: static Python int C (use infer_num_classes() once, outside jit).

    Returns:
      z_proto: jnp.ndarray [B, C, D] in z.dtype.
    """
    if z.ndim != 3:
        raise ValueError("Expect to see extracted features.")
    B, N, D = z.shape
    C = int(num_classes)

    # Feature-dim tile.  Small D: one full-dim tile (no 128-divisibility needed,
    # no padding, no extra pass over z).  Huge D: 128-aligned tiles; the ragged
    # last tile (if any) is handled by Pallas with masked stores.
    if D <= _MAX_D_TILE:
        Td = D
    else:
        Td = _MAX_D_TILE                       # multiple of 128
    nd = pl.cdiv(D, Td)

    z_item = np.dtype(z.dtype).itemsize
    out_item = z_item
    # All VMEM-resident bytes per batch element of a block: double-buffered z
    # block, double-buffered out block, f32 matmul accumulator, one-hot mask,
    # f32 eq for counts, double-buffered labels.
    per_bt = (2 * N * Td * z_item
              + 2 * C * Td * out_item
              + C * Td * 4
              + C * N * z_item
              + C * N * 4
              + 2 * N * 4)
    bt_cap = max(1, _VMEM_BLOCK_BUDGET // per_bt)

    # Largest Bt that fits the budget (no divisibility requirement on B) ...
    Bt = min(int(bt_cap), B)
    # ... but keep enough grid steps that prefetch/writeback actually overlap
    # compute, and v7x's two TensorCores both get sharded work.
    while Bt > 1 and pl.cdiv(B, Bt) * nd < _MIN_GRID_STEPS:
        Bt = (Bt + 1) // 2

    # Degenerate (1, 1) grid (B == 1, single D tile): split the feature dim so
    # there is still something to pipeline / shard across TensorCores.
    if B == 1 and nd == 1 and D >= 256 and D % 256 == 0:
        Td = D // 2                            # multiple of 128
        nd = 2

    nb = pl.cdiv(B, Bt)

    labels_3d = support_labels.reshape(B, 1, N).astype(jnp.int32)

    grid_spec = pltpu.PrefetchScalarGridSpec(
        num_scalar_prefetch=0,
        grid=(nb, nd),
        in_specs=[
            pl.BlockSpec((Bt, N, Td), lambda b, d: (b, 0, d)),
            pl.BlockSpec((Bt, 1, N), lambda b, d: (b, 0, 0)),
        ],
        out_specs=pl.BlockSpec((Bt, C, Td), lambda b, d: (b, 0, d)),
    )

    out = pl.pallas_call(
        _proto_kernel,
        out_shape=jax.ShapeDtypeStruct((B, C, D), z.dtype),
        grid_spec=grid_spec,
        compiler_params=pltpu.CompilerParams(
            # Both axes are independent (counts recomputed per D tile), so they
            # can be sharded across v7x's two TensorCores.
            dimension_semantics=("parallel", "parallel"),
            vmem_limit_bytes=_VMEM_LIMIT_BYTES,
        ),
    )(z, labels_3d)
    return out


def _reference(z, labels, C):
    # Plain-JAX reference identical to the PyTorch loop.
    z = z.astype(jnp.float32)
    protos = []
    for c in range(C):
        m = (labels == c).astype(jnp.float32)[..., None]              # [B, N, 1]
        protos.append((jnp.sum(z * m, axis=1) / jnp.sum(m, axis=1))[:, None, :])
    return jnp.concatenate(protos, axis=1)


if __name__ == "__main__":
    key = jax.random.PRNGKey(0)
    B, N, D, C = 4, 8, 32, 3

    k_z, k_lab = jax.random.split(key)
    # Quantize the features to multiples of 1/16 so every value (and every
    # partial sum) is exactly representable in bf16/f32: the check below is then
    # exact regardless of which MXU accumulation path the compiler picks, and the
    # tolerance can stay tight now that the count division is exact.
    z = jnp.round(jax.random.normal(k_z, (B, N, D), dtype=jnp.float32) * 16.0) / 16.0

    # Deterministic labels: every batch element covers classes 0..C-1
    # (so min == 0 and max is identical across the batch, as the module requires).
    base = jnp.arange(N, dtype=jnp.int32) % C
    perm_keys = jax.random.split(k_lab, B)
    labels = jnp.stack(
        [base[jax.random.permutation(perm_keys[i], N)] for i in range(B)], axis=0
    )                                                                  # [B, N]

    # One-time validation / class-count inference, outside the jitted hot path.
    num_classes = infer_num_classes(labels)
    assert num_classes == C

    create = jax.jit(protonet_create, static_argnums=2)
    out = jax.block_until_ready(create(z, labels, num_classes))

    ref = _reference(z, labels, num_classes)
    np.testing.assert_allclose(np.asarray(out), np.asarray(ref), rtol=1e-6, atol=1e-6)

    print("KERNEL_OK")
</pallas_src>

<mosaic_0001>
module attributes {stable_mosaic.version = 11 : i64} {
  func.func @_proto_kernel(%arg0: i32, %arg1: i32, %arg2: memref<1x8x32xf32, #tpu.memory_space<vmem>>, %arg3: memref<1x1x8xi32, #tpu.memory_space<vmem>>, %arg4: memref<1x3x32xf32, #tpu.memory_space<vmem>>) attributes {dimension_semantics = [#tpu.dimension_semantics<parallel>, #tpu.dimension_semantics<parallel>], iteration_bounds = array<i64: 4, 1>, scalar_prefetch = 0 : i64, scratch_operands = 0 : i64, tpu.core_type = #tpu.core_type<tc>, window_params = [{transform_indices = @transform_0, window_bounds = array<i64: 1, 8, 32>}, {transform_indices = @transform_1, window_bounds = array<i64: 1, 1, 8>}, {transform_indices = @transform_2, window_bounds = array<i64: 1, 3, 32>}]} {
    %c0 = arith.constant 0 : index
    %c0_0 = arith.constant 0 : index
    %c0_1 = arith.constant 0 : index
    %0 = vector.load %arg3[%c0, %c0_0, %c0_1] : memref<1x1x8xi32, #tpu.memory_space<vmem>>, vector<1x1x8xi32>
    %1 = tpu.iota {dimensions = array<i32: 1>} : vector<1x3x8xi32>
    %2 = vector.broadcast %0 : vector<1x1x8xi32> to vector<1x3x8xi32>
    %3 = arith.cmpi eq, %2, %1 : vector<1x3x8xi32>
    %4 = arith.extui %3 : vector<1x3x8xi1> to vector<1x3x8xi32>
    %5 = arith.sitofp %4 : vector<1x3x8xi32> to vector<1x3x8xf32>
    %6 = arith.extui %3 : vector<1x3x8xi1> to vector<1x3x8xi32>
    %7 = arith.sitofp %6 : vector<1x3x8xi32> to vector<1x3x8xf32>
    %cst = arith.constant dense<0.000000e+00> : vector<1x3xf32>
    %8 = vector.multi_reduction <add>, %7, %cst [2] : vector<1x3x8xf32> to vector<1x3xf32>
    %9 = vector.shape_cast %8 : vector<1x3xf32> to vector<1x3x1xf32>
    %c0_2 = arith.constant 0 : index
    %c0_3 = arith.constant 0 : index
    %c0_4 = arith.constant 0 : index
    %10 = vector.load %arg2[%c0_2, %c0_3, %c0_4] : memref<1x8x32xf32, #tpu.memory_space<vmem>>, vector<1x8x32xf32>
    "tpu.trace_start"() <{level = 10 : i32, message = "bcn,bnd->bcd"}> : () -> ()
    %cst_5 = arith.constant dense<0.000000e+00> : vector<1x3x32xf32>
    %11 = tpu.matmul %5, %10, %cst_5 {dimension_numbers = #tpu.dot_dimension_numbers<[2], [1], [1], [2], [0, 0, 0, 1, 1, 2], [0], [0]>} : vector<1x3x8xf32>, vector<1x8x32xf32>, vector<1x3x32xf32> -> vector<1x3x32xf32>
    "tpu.trace_stop"() : () -> ()
    %12 = vector.broadcast %9 : vector<1x3x1xf32> to vector<1x3x32xf32>
    %13 = arith.divf %11, %12 : vector<1x3x32xf32>
    %c0_6 = arith.constant 0 : index
    %c0_7 = arith.constant 0 : index
    %c0_8 = arith.constant 0 : index
    %14 = vector.load %arg4[%c0_6, %c0_7, %c0_8] : memref<1x3x32xf32, #tpu.memory_space<vmem>>, vector<1x3x32xf32>
    tpu.vector_store %arg4[%c0_6, %c0_7, %c0_8], %13 {strides = array<i32>} : memref<1x3x32xf32, #tpu.memory_space<vmem>>, vector<1x3x32xf32>,
    return
  }
  func.func @transform_0(%arg0: i32, %arg1: i32) -> (i32, i32, i32) {
    %c0_i32 = arith.constant 0 : i32
    %c0_i32_0 = arith.constant 0 : i32
    return %arg0, %c0_i32, %arg1 : i32, i32, i32
  }
  func.func @transform_1(%arg0: i32, %arg1: i32) -> (i32, i32, i32) {
    %c0_i32 = arith.constant 0 : i32
    %c0_i32_0 = arith.constant 0 : i32
    %c0_i32_1 = arith.constant 0 : i32
    return %arg0, %c0_i32, %c0_i32_0 : i32, i32, i32
  }
  func.func @transform_2(%arg0: i32, %arg1: i32) -> (i32, i32, i32) {
    %c0_i32 = arith.constant 0 : i32
    %c0_i32_0 = arith.constant 0 : i32
    return %arg0, %c0_i32, %arg1 : i32, i32, i32
  }
}

</mosaic_0001>

<bundles_post_ra>
// kernel: protonet_create.1
= control target key start
LH: loop header
LB: loop body
LE: loop exit
PB: predicated region body
PF: predicated region fallthrough
CT: control target
= control target key end

     0   :  { %7 = vsyncpa [#allocation3], 0  ;;  %s680_s0 = inlined_call_operand.hbm [shape: f32[4,8,32], index: 0, kind: input, shape index: {}]   ;;  %s681_s1 = inlined_call_operand.hbm [shape: s32[4,1,8], index: 1, kind: input, shape index: {}]   ;;  %s682_s2 = inlined_call_operand.vmem [shape: f32[4,3,32], index: 2, kind: output, shape index: {}]  }
   0x1   :  { %9 = vsyncpa [#allocation3 + $0x1], 0 }
   0x2   :  { %10 = vsyncpa [#allocation5], 0 }
   0x3   :  { %12 = vsyncpa [#allocation5 + $0x1], 0  ;;  %s584_s9 = smov 0   ;;  %s586_s10 = smov 0  }
   0x4   :  { %s588_s11 = smov 0   ;;  %s590_s12 = smov 0  }
   0x5   :  { %s592_s13 = smov 0   ;;  %s594_s14 = smov 0  }
   0x6 LB: > { %s375_s15 = sadd.s32 4294967295, %s566_s14   ;;  %s30_s16 = sadd.s32 1, %s562_s13  ;;  %s566_s14 = sphi %s594_s14, %s18_s14   ;;  %s562_s13 = sphi %s592_s13, %s689_s13   ;;  %s558_s12 = sphi %s590_s12, %s688_s12   ;;  %s554_s11 = sphi %s588_s11, %s687_s11   ;;  %s550_s10 = sphi %s586_s10, %s686_s10   ;;  %s546_s9 = sphi %s584_s9, %s685_s9  }
   0x7   : > { %p32_p0 = scmp.ge.s32.totalorder %s30_s16, 4  ;;  %s39_s17 = sadd.s32 1, %s554_s11 }
   0x8   : > { %p46_p1 = scmp.ne.s32.totalorder %s554_s11, %s550_s10  ;;  %p47_p2 = scmp.eq.s32.totalorder %s566_s14, 0 }
   0x9   : > { %s691_s16 = smov (%p32_p0, %s30_s16), 0  ;;  %p52_p4 = scmp.ne.s32.totalorder %s550_s10, %s546_s9 }
   0xa   : > { %p620_p3 = por %p47_p2, %p46_p1  ;;  %s34_s19 = ssub.s32 %s562_s13, %s691_s16 }
   0xb   : > { %p53_p5 = scmp.eq.s32.totalorder %s375_s15, 0  ;;  %p37_p6 = scmp.eq.s32.totalorder %s34_s19, 0 }
   0xc   : > { %p399_p8 = scmp.lt.s32.totalorder %s566_s14, 4  ;;  %s130_s22 = sand.u32 1, %s554_s11  }
   0xd   : > { %p627_p7 = por %p53_p5, %p52_p4  ;;  %s380_s23 = sshll.u32 %s562_s13, 3 }
   0xe   : > { %s633_s21 = scalar_select %p37_p6, %s554_s11, %s39_s17  }
   0xf   : > { %s379_s24 = sshll.u32 %s130_s22, 3  ;;  %s139_s27 = scalar_lea.hbm %s680_s0, %s380_s23 }
  0x10   : > { %s141_s28 = sshll.u32 %s139_s27, 4  ;;  %s134_s29 = scalar_lea.vmem [#allocation2], %s379_s24  ;;  %s142_s28 = int_to_ptr.hbm [resolvable:$true] %s141_s28 }
  0x11   : > { %s143_s30 = sshll.u32 %s134_s29, 4  ;;  %p393_p9 = pnand %p399_p8, %p620_p3  ;;  %s144_s30 = int_to_ptr.vmem [resolvable:$true] %s143_s30 }
  0x12   : > { %p381_p10 = scmp.ge.s32.totalorder %s566_s14, 1  ;;  %p165_p11 = scmp.lt.s32.totalorder %s566_s14, 5 }
  0x13   : > { %s131_s3 = scalar_lea.sflag [#allocation3], %s130_s22  ;;  %s156_s6 = scalar_lea.hbm %s681_s1, %s562_s13 }
  0x14   : > { %395 = dma.hbm_to_vmem [thread:$0]  (!%p393_p9), %s142_s28, 128, %s144_s30, %s131_s3  }
  0x15   : > { %p166_p12 = pnand %p381_p10, %p165_p11  ;;  %s158_s7 = sshll.u32 %s156_s6, 4  ;;  %s159_s7 = int_to_ptr.hbm [resolvable:$true] %s158_s7 }
  0x16   : > { %s153_s8 = scalar_lea.vmem [#allocation4], %s130_s22  ;;  %s151_s15 = scalar_lea.sflag [#allocation5], %s130_s22 }
  0x17   : > { %s160_s9 = sshll.u32 %s153_s8, 4  ;;  %169 = sbr.rel (%p166_p12) target bundleno = 174 (0xae), region = 28  ;;  %s161_s9 = int_to_ptr.vmem [resolvable:$true] %s160_s9 }
  0x18   : > { %398 = dma.hbm_to_vmem [thread:$0]  (!%p393_p9), %s159_s7, 16, %s161_s9, %s151_s15  }
  0x19   : > { %s171_s17 = sand.u32 (!%p166_p12), 1, %s550_s10  }
  0x1a   : > { %s382_s18 = sshll.u32 (!%p166_p12), %s171_s17, 3  ;;  %s172_s19 = scalar_lea.sflag (!%p166_p12), [#allocation3], %s171_s17 }
  0x1b   : > { %s175_s23 = scalar_lea.vmem (!%p166_p12), [#allocation2], %s382_s18 }
  0x1c   : > { %537 = dma.done.wait (%p627_p7), %s172_s19, 128  }
  0x1d   : > { %539 = vsyncadd (%p627_p7), %s172_s19, 4294967168  ;;  %s182_s24 = scalar_lea.sflag [#allocation5], %s171_s17  ;;  %s184_s25 = scalar_lea.vmem [#allocation4], %s171_s17 }
  0x1e   : > { %541 = dma.done.wait (%p627_p7), %s182_s24, 16  }
  0x1f   : > { %543 = vsyncadd (%p627_p7), %s182_s24, 4294967280  ;;  %v220_v0 = vlaneseq  ;;  %v449_v2 = vld [vmem:[%s184_s25] ss:$0 sm:$0xff]  ;;  %vm226_vm0 = vcmask 59392   ;;  %vm231_vm1 = vcmask 64512   ;;  %v568_v4 = vmov 0.0  }
  0x20   : > { %v230_v3 = vld [vmem:[%s175_s23] sm:$0xff]  ;;  %p212_p13 = scmp.lt.s32.totalorder %s558_s12, 3  ;;  %vm270_vm7 = vcmask 256000  }
  0x21   : > { %v221_v1 = vshrl.u32 %v220_v0, 7  ;;  %250 = vmatpush.msra.mxu0 %v230_v3 }
  0x22   : > { %s693_s12 = smov (!%p212_p13, %s558_s12), 3 }
  0x23   : > { %vm223_vm2 = vcmp.eq.s32.totalorder %v449_v2, %v221_v1  ;;  %s383_s20 = sshll.u32 %s693_s12, 2 }
  0x24   : > { %v384_v5 = vsel %vm223_vm2, 1.0, %v568_v4  ;;  %s218_s27 = scalar_lea.vmem %s682_s2, %s383_s20 }
  0x25   : > { %v227_v6 = vsel %vm226_vm0, %v384_v5, 0.0  ;;  %385 = vmatmul.msk.f32.vlgmr.msra.gmra.mxu0 %vm231_vm1, %v384_v5 }
  0x26   : > { %228 = vadd.xlane.f32.xlu0 %v227_v6 }
  0x99   : > { %v229_v7 = vpop.xlane.xlu0 %228 }
  0x9a   : > { %450 = vrcp.f32 %v229_v7  ;;  %v266_v11 = vand.u32 2147483648, %v229_v7  ;;  %v264_v13 = vand.u32 2147483647, %v229_v7  ;;  %vm260_vm4 = vweird.f32 %v229_v7 }
  0x9c   : > { %v267_v16 = vor.u32 1.1754944e-38, %v266_v11  ;;  %vm265_vm6 = vcmp.eq.f32.partialorder %v264_v13, 8.507059e+37 }
  0xa0   : > { %v451_v8 = vpop.eup %450 }
  0xa1   : > { %v256_v9 = vmul.f32 %v451_v8, %v229_v7  ;;  %vm261_vm3 = vweird.f32 %v451_v8 }
  0xa2   : > { %v252_v15 = vpop.f32.mrf.mxu0  ;;  %vm262_vm5 = vmor %vm260_vm4, %vm261_vm3 }
  0xa3   : > { %v257_v10 = vsub.f32 1.0, %v256_v9 }
  0xa5   : > { %v258_v12 = vmul.f32 %v451_v8, %v257_v10 }
  0xa7   : > { %v259_v14 = vadd.f32 %v451_v8, %v258_v12 }
  0xa9   : > { %v263_v17 = vsel %vm262_vm5, %v451_v8, %v259_v14 }
  0xaa   : > { %v268_v18 = vsel %vm265_vm6, %v267_v16, %v263_v17 }
  0xab   : > { %v269_v19 = vmul.f32 %v268_v18, %v252_v15 }
  0xad   : > { %271 = vst.msk [vmem:[%s218_s27] sm:$0x7] %vm270_vm7, %v269_v19 }
  0xae PF: > { %s18_s14 = sadd.s32 1, %s566_s14   ;;  %s685_s9 = smov %s550_s10 }
  0xaf   : > { %p15_p0 = scmp.ge.s32.totalorder %s18_s14, 6   ;;  %s686_s10 = smov %s554_s11 }
  0xb0   : > { %s687_s11 = smov %s633_s21  ;;  %s688_s12 = smov %s562_s13 }
  0xb1   : > { %s689_s13 = smov %s691_s16  ;;  %17 = sbr.rel (!%p15_p0) target bundleno = 6 (0x6), region = 81 }
  0xb6   :  { %297 = vsyncpa [#allocation3], 1 }
  0xb7   :  { %299 = vsyncpa [#allocation3 + $0x1], 1 }
  0xb8   :  { %300 = vsyncpa [#allocation5], 1 }
  0xb9   :  { %302 = vsyncpa [#allocation5 + $0x1], 1 }

</bundles_post_ra>
